<compile_context>
chip_gen: v7x
topology: tpu7x:2x2x1
jax: 0.10.0
libtpu: 0.0.40
codegen_flags: <defaults>
</compile_context>

<pallas_src>
import functools

import jax
import jax.numpy as jnp
from jax.experimental import pallas as pl
from jax.experimental.pallas import tpu as pltpu

_LANE_GRAN = 512       # batch-tile granularity (multiple of the 128-lane vreg width)
_MAX_TILE_B = 32768    # default tile cap; double-buffered footprint stays a few MiB of VMEM
_SPLIT_THRESHOLD = 8192  # batches at/above this get an even tile count (keeps both v7x TCs busy)


def _cdiv(a, b):
    return -(-a // b)


def _round_up(v, m):
    return _cdiv(v, m) * m


def _pick_tiling(batch, max_tile_b):
    """Batch-adaptive tile size: single tile for small B, big even-count tiles for large B."""
    assert max_tile_b >= _LANE_GRAN and max_tile_b % _LANE_GRAN == 0
    target = _round_up(batch, _LANE_GRAN)
    if target < _SPLIT_THRESHOLD:
        tile_b = min(target, max_tile_b)
    else:
        n = max(2, _cdiv(batch, max_tile_b))
        if n % 2:
            n += 1  # even grid-step count -> balanced across v7x's two TensorCores
        tile_b = min(_round_up(_cdiv(batch, n), _LANE_GRAN), max_tile_b)
    num_tiles = _cdiv(batch, tile_b)
    return tile_b, num_tiles


def _pack_params(params):
    """Pack W1,b1,W2,b2,W3,b3 into one (32, 17) f32 array (weights at lane 0, biases at lane 16).

    Row bands start at sublane multiples of 8 so the in-kernel static slices stay aligned.
    """
    w1, b1, w2, b2, w3, b3 = params
    p = jnp.zeros((32, 17), jnp.float32)
    p = p.at[0:16, 0:7].set(w1.astype(jnp.float32))
    p = p.at[0:16, 16].set(b1.astype(jnp.float32))
    p = p.at[16:24, 0:16].set(w2.astype(jnp.float32))
    p = p.at[16:24, 16].set(b2.astype(jnp.float32))
    p = p.at[24, 0:8].set(w3.reshape(8).astype(jnp.float32))
    p = p.at[24, 16].set(b3.reshape(()).astype(jnp.float32))
    return p


def titanic_mlp_kernel(x_ref, p_ref, o_ref, *, compute_dtype):
    """Whole forward pass for one lane-dense (7, tile_b) batch tile resident in VMEM."""
    x = x_ref[...]                                   # (7, TB) compute_dtype (bf16 or f32)

    # Static, aligned slices of the single packed-parameter operand (resident across grid steps).
    w1 = p_ref[0:16, 0:7].astype(compute_dtype)      # (16, 7)
    b1 = p_ref[0:16, 16:17]                          # (16, 1) f32
    w2 = p_ref[16:24, 0:16].astype(compute_dtype)    # (8, 16)
    b2 = p_ref[16:24, 16:17]                         # (8, 1)  f32
    w3 = p_ref[24:25, 0:8].astype(compute_dtype)     # (1, 8)
    b3 = p_ref[24:25, 16:17]                         # (1, 1)  f32

    h1 = jnp.dot(w1, x, preferred_element_type=jnp.float32)    # (16, TB) f32 accumulation
    h1 = jnp.maximum(h1 + b1, 0.0).astype(compute_dtype)
    h2 = jnp.dot(w2, h1, preferred_element_type=jnp.float32)   # (8, TB)
    h2 = jnp.maximum(h2 + b2, 0.0).astype(compute_dtype)
    z = jnp.dot(w3, h2, preferred_element_type=jnp.float32)    # (1, TB)
    z = z + b3
    # Explicit sigmoid (exp -> EUP slot, plus one divide); dense (1, TB) lane-major store.
    o_ref[...] = (1.0 / (1.0 + jnp.exp(-z))).astype(o_ref.dtype)


def _forward_impl(x_fm, params, max_tile_b, use_bf16):
    """x_fm: (7, B) feature-major input. Returns (B, 1) f32 probabilities."""
    f, batch = x_fm.shape
    assert f == 7, "TitanicNet expects 7 input features"
    compute_dtype = jnp.bfloat16 if use_bf16 else jnp.float32

    tile_b, num_tiles = _pick_tiling(batch, max_tile_b)
    b_pad = num_tiles * tile_b

    x_fm = x_fm.astype(compute_dtype)                # bf16 halves the dominant input DMA bytes
    if b_pad != batch:
        x_fm = jnp.pad(x_fm, ((0, 0), (0, b_pad - batch)))  # <512*n cols of pad (adaptive tile)

    packed = _pack_params(params)                    # single tiny resident operand

    out = pl.pallas_call(
        functools.partial(titanic_mlp_kernel, compute_dtype=compute_dtype),
        out_shape=jax.ShapeDtypeStruct((1, b_pad), jnp.float32),
        grid_spec=pltpu.PrefetchScalarGridSpec(
            num_scalar_prefetch=0,
            grid=(num_tiles,),
            in_specs=[
                pl.BlockSpec((7, tile_b), lambda i: (0, i)),   # lane-dense batch tile
                pl.BlockSpec((32, 17), lambda i: (0, 0)),      # packed params, resident
            ],
            out_specs=pl.BlockSpec((1, tile_b), lambda i: (0, i)),
        ),
        compiler_params=pltpu.CompilerParams(
            dimension_semantics=("parallel",),       # batch tiles shard across TCs on v7x
        ),
    )(x_fm, packed)                                  # (1, b_pad)

    return out[0, :batch].reshape(batch, 1)


@functools.partial(jax.jit, static_argnames=("max_tile_b", "use_bf16"))
def titanic_net_forward_fm(x_fm, params, *, max_tile_b=_MAX_TILE_B, use_bf16=True):
    """Feature-major entry point: x_fm is (7, B). Avoids the wrapper-side transpose HBM pass."""
    return _forward_impl(x_fm, params, max_tile_b, use_bf16)


@functools.partial(jax.jit, static_argnames=("max_tile_b", "use_bf16"))
def titanic_net_forward(x, params, *, max_tile_b=_MAX_TILE_B, use_bf16=True):
    """PyTorch-layout entry point: x is (B, 7). Returns (B, 1) probabilities."""
    return _forward_impl(x.T, params, max_tile_b, use_bf16)


def init_params(key):
    """nn.Linear-style init: U(-1/sqrt(fan_in), 1/sqrt(fan_in)); W is (out, in), b is (out,)."""
    dims = [(7, 16), (16, 8), (8, 1)]
    params = []
    for fan_in, fan_out in dims:
        key, kw, kb = jax.random.split(key, 3)
        bound = 1.0 / jnp.sqrt(float(fan_in))
        w = jax.random.uniform(kw, (fan_out, fan_in), jnp.float32, -bound, bound)
        b = jax.random.uniform(kb, (fan_out,), jnp.float32, -bound, bound)
        params += [w, b]
    return tuple(params)


def reference_forward(x, params):
    """Pure-JAX reference matching PyTorch semantics: y = sigmoid(relu(relu(xW1^T+b1)W2^T+b2)W3^T+b3)."""
    w1, b1, w2, b2, w3, b3 = params
    h1 = jnp.maximum(x @ w1.T + b1, 0.0)
    h2 = jnp.maximum(h1 @ w2.T + b2, 0.0)
    return jax.nn.sigmoid(h2 @ w3.T + b3)


if __name__ == "__main__":
    key = jax.random.PRNGKey(0)
    kx, kx2, kp = jax.random.split(key, 3)
    params = init_params(kp)

    # Small ragged batch (padded to a single 512-column tile), PyTorch (B, 7) interface.
    B = 300
    x = jax.random.normal(kx, (B, 7), jnp.float32)
    ref = reference_forward(x, params)

    # 1) Exact f32 path.
    out_f32 = jax.block_until_ready(titanic_net_forward(x, params, use_bf16=False))
    assert out_f32.shape == (B, 1)
    assert jnp.allclose(out_f32, ref, atol=1e-5, rtol=1e-5)

    # 2) Default fast path: bf16 MXU operands with f32 accumulation (looser tolerance).
    out_bf16 = jax.block_until_ready(titanic_net_forward(x, params))
    assert out_bf16.shape == (B, 1)
    assert jnp.allclose(out_bf16, ref, atol=3e-2, rtol=0.0)

    # 3) Feature-major entry (no wrapper transpose) + multi-tile grid (max_tile_b forced small
    #    so this small test exercises several "parallel" grid steps and ragged padding).
    B2 = 1100
    x2_fm = jax.random.normal(kx2, (7, B2), jnp.float32)
    out2 = jax.block_until_ready(
        titanic_net_forward_fm(x2_fm, params, max_tile_b=512, use_bf16=False))
    ref2 = reference_forward(x2_fm.T, params)
    assert out2.shape == (B2, 1)
    assert jnp.allclose(out2, ref2, atol=1e-5, rtol=1e-5)

    print("KERNEL_OK")
</pallas_src>

<mosaic_0001>
module attributes {stable_mosaic.version = 11 : i64} {
  func.func @titanic_mlp_kernel(%arg0: i32, %arg1: memref<7x512xf32, #tpu.memory_space<vmem>>, %arg2: memref<32x17xf32, #tpu.memory_space<vmem>>, %arg3: memref<1x512xf32, #tpu.memory_space<vmem>>) attributes {dimension_semantics = [#tpu.dimension_semantics<parallel>], iteration_bounds = array<i64: 1>, scalar_prefetch = 0 : i64, scratch_operands = 0 : i64, tpu.core_type = #tpu.core_type<tc>, window_params = [{transform_indices = @transform_0, window_bounds = array<i64: 7, 512>}, {pipeline_mode = #tpu.pipeline_mode<synchronous>, transform_indices = @transform_1, window_bounds = array<i64: 32, 17>}, {transform_indices = @transform_2, window_bounds = array<i64: 1, 512>}]} {
    %c0 = arith.constant 0 : index
    %c0_0 = arith.constant 0 : index
    %0 = vector.load %arg1[%c0, %c0_0] : memref<7x512xf32, #tpu.memory_space<vmem>>, vector<7x512xf32>
    %c0_1 = arith.constant 0 : index
    %c0_2 = arith.constant 0 : index
    %1 = vector.load %arg2[%c0_1, %c0_2] : memref<32x17xf32, #tpu.memory_space<vmem>>, vector<16x7xf32>
    %c0_3 = arith.constant 0 : index
    %c16 = arith.constant 16 : index
    %2 = vector.load %arg2[%c0_3, %c16] : memref<32x17xf32, #tpu.memory_space<vmem>>, vector<16x1xf32>
    %c16_4 = arith.constant 16 : index
    %c0_5 = arith.constant 0 : index
    %3 = vector.load %arg2[%c16_4, %c0_5] : memref<32x17xf32, #tpu.memory_space<vmem>>, vector<8x16xf32>
    %c16_6 = arith.constant 16 : index
    %c16_7 = arith.constant 16 : index
    %4 = vector.load %arg2[%c16_6, %c16_7] : memref<32x17xf32, #tpu.memory_space<vmem>>, vector<8x1xf32>
    %c24 = arith.constant 24 : index
    %c0_8 = arith.constant 0 : index
    %5 = vector.load %arg2[%c24, %c0_8] : memref<32x17xf32, #tpu.memory_space<vmem>>, vector<1x8xf32>
    %c24_9 = arith.constant 24 : index
    %c16_10 = arith.constant 16 : index
    %6 = vector.load %arg2[%c24_9, %c16_10] : memref<32x17xf32, #tpu.memory_space<vmem>>, vector<1x1xf32>
    %cst = arith.constant dense<0.000000e+00> : vector<16x512xf32>
    %7 = tpu.matmul %1, %0, %cst {dimension_numbers = #tpu.dot_dimension_numbers<[1], [0], [0], [1], [0, 0, 1, 1], [], []>} : vector<16x7xf32>, vector<7x512xf32>, vector<16x512xf32> -> vector<16x512xf32>
    %8 = vector.broadcast %2 : vector<16x1xf32> to vector<16x512xf32>
    %9 = arith.addf %7, %8 : vector<16x512xf32>
    %cst_11 = arith.constant 0.000000e+00 : f32
    %10 = vector.broadcast %cst_11 : f32 to vector<16x512xf32>
    %11 = arith.maximumf %9, %10 : vector<16x512xf32>
    %cst_12 = arith.constant dense<0.000000e+00> : vector<8x512xf32>
    %12 = tpu.matmul %3, %11, %cst_12 {dimension_numbers = #tpu.dot_dimension_numbers<[1], [0], [0], [1], [0, 0, 1, 1], [], []>} : vector<8x16xf32>, vector<16x512xf32>, vector<8x512xf32> -> vector<8x512xf32>
    %13 = vector.broadcast %4 : vector<8x1xf32> to vector<8x512xf32>
    %14 = arith.addf %12, %13 : vector<8x512xf32>
    %cst_13 = arith.constant 0.000000e+00 : f32
    %15 = vector.broadcast %cst_13 : f32 to vector<8x512xf32>
    %16 = arith.maximumf %14, %15 : vector<8x512xf32>
    %cst_14 = arith.constant dense<0.000000e+00> : vector<1x512xf32>
    %17 = tpu.matmul %5, %16, %cst_14 {dimension_numbers = #tpu.dot_dimension_numbers<[1], [0], [0], [1], [0, 0, 1, 1], [], []>} : vector<1x8xf32>, vector<8x512xf32>, vector<1x512xf32> -> vector<1x512xf32>
    %18 = vector.broadcast %6 : vector<1x1xf32> to vector<1x512xf32>
    %19 = arith.addf %17, %18 : vector<1x512xf32>
    %cst_15 = arith.constant 0.000000e+00 : f32
    %20 = vector.broadcast %cst_15 : f32 to vector<1x512xf32>
    %21 = arith.subf %20, %19 : vector<1x512xf32>
    %22 = math.exp %21 : vector<1x512xf32>
    %cst_16 = arith.constant 1.000000e+00 : f32
    %23 = vector.broadcast %cst_16 : f32 to vector<1x512xf32>
    %24 = arith.addf %23, %22 : vector<1x512xf32>
    %cst_17 = arith.constant 1.000000e+00 : f32
    %25 = vector.broadcast %cst_17 : f32 to vector<1x512xf32>
    %26 = arith.divf %25, %24 : vector<1x512xf32>
    %c0_18 = arith.constant 0 : index
    %c0_19 = arith.constant 0 : index
    %27 = vector.load %arg3[%c0_18, %c0_19] : memref<1x512xf32, #tpu.memory_space<vmem>>, vector<1x512xf32>
    tpu.vector_store %arg3[%c0_18, %c0_19], %26 {strides = array<i32>} : memref<1x512xf32, #tpu.memory_space<vmem>>, vector<1x512xf32>,
    return
  }
  func.func @transform_0(%arg0: i32) -> (i32, i32) {
    %c0_i32 = arith.constant 0 : i32
    %c0_i32_0 = arith.constant 0 : i32
    return %c0_i32, %arg0 : i32, i32
  }
  func.func @transform_1(%arg0: i32) -> (i32, i32) {
    %c0_i32 = arith.constant 0 : i32
    %c0_i32_0 = arith.constant 0 : i32
    %c0_i32_1 = arith.constant 0 : i32
    return %c0_i32, %c0_i32_0 : i32, i32
  }
  func.func @transform_2(%arg0: i32) -> (i32, i32) {
    %c0_i32 = arith.constant 0 : i32
    %c0_i32_0 = arith.constant 0 : i32
    return %c0_i32, %arg0 : i32, i32
  }
}

</mosaic_0001>

<bundles_post_ra>
// kernel: titanic_net_forward.1
= control target key start
LH: loop header
LB: loop body
LE: loop exit
PB: predicated region body
PF: predicated region fallthrough
CT: control target
= control target key end

     0   :  { %vm34_vm0 = vcmask 1046528   ;;  %vm29_vm1 = vcmask 56320   ;;  %v616_v3 = vmov 0.0   ;;  %v617_v7 = vmov 16   ;;  %s673_s0 = inlined_call_operand.vmem [shape: f32[7,512], index: 0, kind: input, shape index: {}]   ;;  %s674_s1 = inlined_call_operand.vmem [shape: f32[32,17], index: 1, kind: input, shape index: {}]   ;;  %s675_s2 = inlined_call_operand.vmem [shape: f32[1,512], index: 2, kind: output, shape index: {}]  }
   0x1   :  { %v12_v0 = vld [vmem:[%s673_s0 + $0x8] sm:$0x7f]  ;;  %v14_v1 = vld [vmem:[%s673_s0 + $0x18] sm:$0x7f]  ;;  %v11_v2 = vld [vmem:[%s673_s0] sm:$0x7f]  ;;  %111 = vmatprep.mubr.f32.mxu0 %v616_v3  ;;  %188 = vmatprep.mubr.f32.mxu1 %v616_v3 }
   0x2   :  { %575 = vmatprep.subr.msk.mxu0 %vm34_vm0, %v12_v0  ;;  %579 = vmatprep.subr.msk.mxu1 %vm34_vm0, %v14_v1  ;;  %v13_v4 = vld [vmem:[%s673_s0 + $0x10] sm:$0x7f]  ;;  %v15_v5 = vld [vmem:[%s674_s1] sm:$0xff]  ;;  %v16_v6 = vld [vmem:[%s674_s1 + $0x8] sm:$0xff]  ;;  %vm214_vm2 = vcmask 130048   ;;  %vm368_vm3 = vcmask 64512  }
   0x3   :  { %576 = vmatpush1.msk.msra.mxu0 %vm34_vm0, %v11_v2  ;;  %580 = vmatpush1.msk.msra.mxu1 %vm34_vm0, %v13_v4  ;;  %v17_v8 = vld [vmem:[%s674_s1 + $0x10] sm:$0xff]  ;;  %v18_v9 = vld [vmem:[%s674_s1 + $0x18] sm:$0x1] }
   0x4   :  { %577 = vmatmul.mubr.msk.f32.vlgmr.msra.gmra.mrb[0].mxu0 %vm29_vm1, %v15_v5  ;;  %581 = vmatmul.mubr.msk.f32.vlgmr.msra.gmra.mrb[0].mxu1 %vm29_vm1, %v15_v5 }
   0x5   :  { %117 = vmatprep.mubr.f32.mxu0 %v616_v3  ;;  %194 = vmatprep.mubr.f32.mxu1 %v616_v3 }
   0x6   :  { %598 = vset.pattern.permute.xlu0 %v617_v7  ;;  %599 = vset.pattern.permute.xlu1 %v617_v7 }
   0x7   :  { %21 = vperm.xlu0 %598, %v15_v5   ;;  %211 = vperm.xlu1 %599, %v17_v8  }
   0x8   :  { %578 = vmatmul.mubr.msk.f32.gmra.mrb[2].mxu0 %vm29_vm1, %v16_v6  ;;  %582 = vmatmul.mubr.msk.f32.gmra.mrb[2].mxu1 %vm29_vm1, %v16_v6 }
   0x9   :  { %281 = vmatprep.mubr.f32.mxu0 %v616_v3  ;;  %352 = vmatprep.mubr.f32.mxu1 %v616_v3 }
   0xb   :  { %26 = vperm.xlu0 %598, %v16_v6   ;;  %365 = vperm.xlu1 %599, %v18_v9  }
  0x86   :  { %v22_v10 = vpop.permute.xlu0 %21  ;;  %v212_v40 = vpop.permute.xlu1 %211 }
  0x8a   :  { %v27_v17 = vpop.permute.xlu0 %26  ;;  %v366_v53 = vpop.permute.xlu1 %365 }
  0xd7   :  { %v113_v11 = vpop.f32.mrb[0].mxu0  ;;  %v190_v12 = vpop.f32.mrb[0].mxu1 }
  0xd8   :  { %v115_v13 = vpop.f32.mrb[1].mxu0  ;;  %v192_v14 = vpop.f32.mrb[1].mxu1  ;;  %v114_v15 = vadd.f32 %v113_v11, %v22_v10  ;;  %v191_v16 = vadd.f32 %v190_v12, %v22_v10 }
  0xd9   :  { %v116_v18 = vadd.f32 %v115_v13, %v22_v10  ;;  %v193_v19 = vadd.f32 %v192_v14, %v22_v10  ;;  %v618_v14 = vmov 1966171168  }
  0xda   :  { %v201_v28 = vmax.f32 %v114_v15, 0.0  ;;  %v203_v29 = vmax.f32 %v191_v16, 0.0  ;;  %v544_v15 = vunpack.c.l.s4 %v618_v14  ;;  %v546_v16 = vlaneseq }
  0xdb   :  { %v119_v20 = vpop.f32.mrb[2].mxu0  ;;  %v196_v21 = vpop.f32.mrb[2].mxu1  ;;  %v202_v32 = vmax.f32 %v116_v18, 0.0  ;;  %v204_v33 = vmax.f32 %v193_v19, 0.0 }
  0xdc   :  { %v120_v22 = vadd.f32 %v119_v20, %v27_v17  ;;  %v197_v23 = vadd.f32 %v196_v21, %v27_v17  ;;  %v121_v24 = vpop.f32.mrb[3].mxu0  ;;  %v198_v25 = vpop.f32.mrb[3].mxu1  ;;  %v547_v18 = vshrl.u32 %v546_v16, 7  ;;  %vm568_vm4 = vcmp.lt.s32.totalorder %v546_v16, 512 }
  0xdd   :  { %v122_v26 = vadd.f32 %v121_v24, %v27_v17  ;;  %v199_v27 = vadd.f32 %v198_v25, %v27_v17  ;;  %v545_v17 = vunpack.c.0.s8 %v544_v15 }
  0xde   :  { %v205_v30 = vmax.f32 %v120_v22, 0.0  ;;  %v207_v31 = vmax.f32 %v197_v23, 0.0 }
  0xdf   :  { %v206_v34 = vmax.f32 %v122_v26, 0.0  ;;  %v208_v35 = vmax.f32 %v199_v27, 0.0  ;;  %v548_v21 = vsub.s32 %v545_v17, %v547_v18 }
  0xe0   :  { %v589_v36 = vpack.c.bf16 %v205_v30, %v201_v28  ;;  %v593_v37 = vpack.c.bf16 %v207_v31, %v203_v29 }
  0xe1   :  { %v587_v38 = vpack.c.bf16 %v206_v34, %v202_v32  ;;  %v591_v39 = vpack.c.bf16 %v208_v35, %v204_v33 }
  0xe3   :  { %588 = vmatprep.subr.bf16.mxu0 %v587_v38  ;;  %592 = vmatprep.subr.bf16.mxu1 %v591_v39 }
  0xe4   :  { %590 = vmatpush1.bf16.msra.mxu0 %v589_v36  ;;  %594 = vmatpush1.bf16.msra.mxu1 %v593_v37 }
  0xe7   :  { %583 = vmatmul.mubr.msk.f32.vlgmr.msra.gmra.mrb[4].mxu0 %vm214_vm2, %v17_v8  ;;  %584 = vmatmul.mubr.msk.f32.vlgmr.msra.gmra.mrb[4].mxu1 %vm214_vm2, %v17_v8 }
  0xe8   :  { %435 = vmatprep.mubr.f32.mxu0 %v616_v3  ;;  %506 = vmatprep.mubr.f32.mxu1 %v616_v3 }
 0x1ba   :  { %v283_v41 = vpop.f32.mrb[4].mxu0  ;;  %v354_v42 = vpop.f32.mrb[4].mxu1 }
 0x1bb   :  { %v284_v43 = vadd.f32 %v283_v41, %v212_v40  ;;  %v355_v44 = vadd.f32 %v354_v42, %v212_v40  ;;  %v285_v45 = vpop.f32.mrb[5].mxu0  ;;  %v356_v46 = vpop.f32.mrb[5].mxu1 }
 0x1bc   :  { %v286_v47 = vadd.f32 %v285_v45, %v212_v40  ;;  %v357_v48 = vadd.f32 %v356_v46, %v212_v40 }
 0x1bd   :  { %v359_v51 = vmax.f32 %v284_v43, 0.0  ;;  %v361_v52 = vmax.f32 %v355_v44, 0.0 }
 0x1be   :  { %v360_v49 = vmax.f32 %v286_v47, 0.0  ;;  %v362_v50 = vmax.f32 %v357_v48, 0.0 }
 0x1c0   :  { %371 = vmatprep.subr.mxu0 %v360_v49  ;;  %442 = vmatprep.subr.mxu1 %v362_v50 }
 0x1c1   :  { %372 = vmatpush1.msra.mxu0 %v359_v51  ;;  %443 = vmatpush1.msra.mxu1 %v361_v52 }
 0x1c2   :  { %585 = vmatmul.mubr.msk.f32.vlgmr.msra.gmra.mrb[6].mxu0 %vm368_vm3, %v18_v9  ;;  %586 = vmatmul.mubr.msk.f32.vlgmr.msra.gmra.mrb[6].mxu1 %vm368_vm3, %v18_v9 }
 0x295   :  { %v437_v54 = vpop.f32.mrb[6].mxu0  ;;  %v508_v55 = vpop.f32.mrb[6].mxu1 }
 0x296   :  { %v438_v56 = vadd.f32 %v437_v54, %v366_v53  ;;  %v509_v57 = vadd.f32 %v508_v55, %v366_v53  ;;  %v439_v58 = vpop.f32.mrb[7].mxu0  ;;  %v510_v59 = vpop.f32.mrb[7].mxu1 }
 0x297   :  { %v440_v60 = vadd.f32 %v439_v58, %v366_v53  ;;  %v511_v61 = vadd.f32 %v510_v59, %v366_v53 }
 0x298   :  { %v513_v62 = vsub.f32 0.0, %v438_v56  ;;  %v515_v63 = vsub.f32 0.0, %v509_v57 }
 0x299   :  { %v514_v0 = vsub.f32 0.0, %v440_v60  ;;  %v516_v1 = vsub.f32 0.0, %v511_v61 }
 0x29a   :  { %v517_v2 = vmul.f32 1.442695, %v513_v62  ;;  %v521_v3 = vmul.f32 1.442695, %v515_v63 }
 0x29b   :  { %v519_v4 = vmul.f32 1.442695, %v514_v0  ;;  %v523_v5 = vmul.f32 1.442695, %v516_v1 }
 0x29c   :  { %600 = vpow2.f32 %v517_v2 }
 0x29d   :  { %602 = vpow2.f32 %v521_v3 }
 0x29e   :  { %604 = vpow2.f32 %v519_v4 }
 0x29f   :  { %606 = vpow2.f32 %v523_v5 }
 0x2a6   :  { %v601_v6 = vpop.eup %600 }
 0x2a7   :  { %v603_v7 = vpop.eup %602  ;;  %v525_v8 = vadd.f32 1.0, %v601_v6 }
 0x2a8   :  { %v605_v9 = vpop.eup %604  ;;  %v527_v10 = vadd.f32 1.0, %v603_v7 }
 0x2a9   :  { %v607_v11 = vpop.eup %606  ;;  %608 = vrcp.f32 %v525_v8  ;;  %v526_v12 = vadd.f32 1.0, %v605_v9 }
 0x2aa   :  { %610 = vrcp.f32 %v527_v10  ;;  %v528_v13 = vadd.f32 1.0, %v607_v11 }
 0x2ab   :  { %612 = vrcp.f32 %v526_v12 }
 0x2ac   :  { %614 = vrcp.f32 %v528_v13 }
 0x2b3   :  { %v609_v19 = vpop.eup %608 }
 0x2b4   :  { %v611_v20 = vpop.eup %610 }
 0x2b5   :  { %v613_v22 = vpop.eup %612 }
 0x2b6   :  { %v615_v23 = vpop.eup %614  ;;  %v541_v24 = vcombine.low %v609_v19, %v613_v22 }
 0x2b7   :  { %v542_v25 = vcombine.low %v611_v20, %v615_v23 }
 0x2b8   :  { %v549_v26 = vrot.slane %v541_v24, %v548_v21 }
 0x2b9   :  { %v556_v27 = vrot.slane %v542_v25, %v548_v21 }
 0x2bb   :  { %v557_v28 = vcombine.low %v549_v26, %v556_v27 }
 0x2bd   :  { %v564_v29 = vrot.slane %v557_v28, %v548_v21 }
 0x2bf   :  { %570 = vst.msk [vmem:[%s675_s2] sm:$0xf] %vm568_vm4, %v564_v29 }

</bundles_post_ra>
